<compile_context>
chip_gen: v5e
topology: v5e:2x2
jax: 0.10.0
libtpu: 0.0.40
codegen_flags: <defaults>
</compile_context>

<pallas_src>
import functools

import jax
import jax.numpy as jnp
from jax import lax
from jax.experimental import pallas as pl
from jax.experimental.pallas import tpu as pltpu

_SUBLANES = 8


# --------------------------------------------------------------------------
# Kernel: elementwise LJ on an (8, lane_tile) edge tile + per-sublane MXU
# one-hot scatter into a resident (8, atom_tile) accumulator block.
# --------------------------------------------------------------------------
def _lj_kernel(sig_ref, dlt_ref, eps_ref, len_ref, cut_ref, ctr_ref, out_ref,
               *, exponent, lj_style, atom_tile):
    t = pl.program_id(2)

    @pl.when(t == 0)
    def _init():
        out_ref[...] = jnp.zeros_like(out_ref)

    # _LJParam relu on the gathered per-edge parameters.
    sigma = jnp.maximum(sig_ref[...], 0.0)      # (8, C)
    delta = jnp.maximum(dlt_ref[...], 0.0)
    eps = jnp.maximum(eps_ref[...], 0.0)
    r = len_ref[...]
    cut = cut_ref[...]
    center = ctr_ref[...]                       # int32 (8, C)

    def _pow(x):
        # Integral exponent -> a few VPU muls, no EUP exp/log, no NaN for x<=0.
        if float(exponent).is_integer():
            return lax.integer_pow(x, int(exponent))
        return x ** exponent

    if lj_style == "repulsive":
        lj = 0.5 * eps * pl.reciprocal(_pow(sigma * (r - delta)), approx=False)
    else:
        lj = -_pow(sigma * pl.reciprocal(r - delta, approx=False))
        lj = lj + lj * lj
        lj = 2.0 * eps * lj
        if lj_style == "lj_repulsive_only":
            # Truncation kept exactly as written in the reference module
            # (threshold has no sigma factor).
            lj = lj + eps
            lj = lj * (r < (2.0 ** (1.0 / exponent) + delta)).astype(lj.dtype)

    # Padded edges have cutoff == 0 and eps == 0 -> contribute exactly 0.
    lj = (lj * cut).astype(jnp.bfloat16)        # (8, C) bf16 MXU operand

    # Scatter over the atoms covered by this output block.  Per sublane row:
    # (1, C) x (C, atom_tile) bf16 contraction against a one-hot, accumulated
    # straight into the resident output row (one one-hot live at a time).
    a = pl.program_id(1)
    atom_col = a * atom_tile + lax.broadcasted_iota(
        jnp.int32, (atom_tile, 1), 0)                        # (A, 1) global ids
    for s in range(_SUBLANES):
        oh_t = (atom_col == center[s:s + 1, :]).astype(jnp.bfloat16)   # (A, C)
        row = lax.dot_general(lj[s:s + 1, :], oh_t,
                              (((1,), (1,)), ((), ())),
                              preferred_element_type=jnp.float32)      # (1, A)
        out_ref[s:s + 1, :] += row


# --------------------------------------------------------------------------
# Wrapper: pad/reshape edge fields, build grid/BlockSpecs, reduce partials.
# --------------------------------------------------------------------------
def _default_partitions():
    """2 grid partitions only where a second TensorCore exists per chip."""
    try:
        kind = jax.devices()[0].device_kind.lower()
    except Exception:
        return 1
    if any(tag in kind for tag in ("v4", "v5p", "v7")):   # megacore parts
        return 2
    return 1                                              # v5e / v6e: 1 TC


def lennard_jones_pallas(sigma_e, delta_e, eps_e, edge_len, edge_cutoff,
                         edge_center, num_nodes, per_atom_energy=None, *,
                         exponent=6.0, lj_style="lj", lane_tile=None,
                         atom_tile=None, num_partitions=None):
    assert lj_style in ("lj", "lj_repulsive_only", "repulsive")
    E = int(edge_len.shape[0])
    N = int(num_nodes)
    P = _default_partitions() if num_partitions is None else max(
        1, int(num_partitions))

    # Lane-dense atom axis, tiled so the resident accumulator and the one-hot
    # stay small at large N (bounds VMEM, keeps stores unmasked vst).
    n_lanes = max(128, pl.cdiv(N, 128) * 128)
    if atom_tile is None:
        atom_tile = min(512, n_lanes)
    atom_tile = max(128, (atom_tile // 128) * 128)
    n_pad = pl.cdiv(n_lanes, atom_tile) * atom_tile
    a_tiles = n_pad // atom_tile

    if lane_tile is None:
        # Big edge tiles amortize the per-grid-step overhead; the per-step
        # input working set (6 fields * 8 * lane_tile * 4B, double buffered)
        # stays < 1 MiB even at the 2048 cap.
        lane_tile = min(2048, max(128, int(pl.next_power_of_2(
            pl.cdiv(max(E, 1), P * _SUBLANES)))))
    edges_per_block = _SUBLANES * lane_tile
    tiles_per_part = max(1, pl.cdiv(E, P * edges_per_block))
    E_pad = P * tiles_per_part * edges_per_block
    pad = E_pad - E
    rows = E_pad // lane_tile            # = P * tiles_per_part * 8

    f32 = jnp.float32

    def _prep(x, cv, dtype=f32):
        x = jnp.asarray(x).astype(dtype)
        if pad:
            x = jnp.pad(x, (0, pad), constant_values=cv)
        return x.reshape(rows, lane_tile)

    # Six separate small inputs (no stacked HBM copy); padding values keep
    # padded edges finite and zero-contributing (eps = 0, cutoff = 0).
    sig2 = _prep(sigma_e, 1.0)
    dlt2 = _prep(delta_e, 0.0)
    eps2 = _prep(eps_e, 0.0)
    len2 = _prep(edge_len, 1.0)
    cut2 = _prep(edge_cutoff, 0.0)
    ctr2 = _prep(edge_center, 0, jnp.int32)

    edge_spec = pl.BlockSpec(
        (_SUBLANES, lane_tile),
        lambda p, a, t: (p * tiles_per_part + t, 0))
    out_spec = pl.BlockSpec((_SUBLANES, atom_tile), lambda p, a, t: (p, a))

    kernel = functools.partial(_lj_kernel, exponent=float(exponent),
                               lj_style=lj_style, atom_tile=atom_tile)

    partials = pl.pallas_call(
        kernel,
        out_shape=jax.ShapeDtypeStruct((P * _SUBLANES, n_pad), jnp.float32),
        grid_spec=pltpu.PrefetchScalarGridSpec(
            num_scalar_prefetch=0,
            grid=(P, a_tiles, tiles_per_part),
            in_specs=[edge_spec] * 6,
            out_specs=out_spec,
        ),
        compiler_params=pltpu.CompilerParams(
            # Partition + atom-tile axes are independent (second TC on
            # megacore parts); edge-tile axis accumulates into the resident
            # output block.
            dimension_semantics=("parallel", "parallel", "arbitrary")),
    )(sig2, dlt2, eps2, len2, cut2, ctr2)

    atomic = jnp.sum(partials.reshape(P, _SUBLANES, n_pad), axis=(0, 1))
    atomic = atomic[:N].reshape(N, 1)
    if per_atom_energy is not None:
        atomic = atomic + per_atom_energy.astype(f32).reshape(N, 1)
    return atomic


# --------------------------------------------------------------------------
# Parameter setup glue (mirrors LennardJones.__init__ and _LJParam symmetrize)
# --------------------------------------------------------------------------
def store_param(value, num_types):
    value = jnp.asarray(value, dtype=jnp.float32)
    if value.ndim == 0:
        return jnp.ones((num_types, num_types), jnp.float32) * value
    elif value.ndim == 2:
        assert value.shape == (num_types, num_types)
        return jnp.triu(value)
    raise ValueError("lj parameters must be scalar or (num_types, num_types)")


def symmetrize(param):
    """_LJParam: triu + triu(1).T (relu is applied in-kernel)."""
    return jnp.triu(param) + jnp.triu(param, 1).T


def reference(sigma_e, delta_e, eps_e, edge_len, edge_cutoff, edge_center,
              per_atom_energy, num_nodes, exponent=6.0, lj_style="lj"):
    sig = jnp.maximum(sigma_e, 0.0)
    dlt = jnp.maximum(delta_e, 0.0)
    eps = jnp.maximum(eps_e, 0.0)
    if lj_style == "repulsive":
        lj = 0.5 * eps * (sig * (edge_len - dlt)) ** (-exponent)
    else:
        lj = (sig / (edge_len - dlt)) ** exponent
        lj = -lj
        lj = lj + lj * lj
        lj = 2.0 * eps * lj
        if lj_style == "lj_repulsive_only":
            lj = lj + eps
            lj = lj * (edge_len < 2.0 ** (1.0 / exponent) + dlt).astype(lj.dtype)
    lj = lj * edge_cutoff
    atomic = jax.ops.segment_sum(lj, edge_center, num_segments=num_nodes)
    return atomic[:, None] + per_atom_energy


if __name__ == "__main__":
    key = jax.random.PRNGKey(0)
    k1, k2, k3, k4, k5, k6 = jax.random.split(key, 6)

    num_types, N, E = 4, 16, 200
    exponent = 6.0

    # Graph data (AtomicDataDict-like fields)
    atom_types = jax.random.randint(k1, (N, 1), 0, num_types)
    edge_index = jax.random.randint(k2, (2, E), 0, N)
    edge_vec = jax.random.normal(k3, (E, 3), dtype=jnp.float32)
    edge_len = jnp.linalg.norm(edge_vec, axis=-1) + 1.0
    edge_cutoff = jax.random.uniform(k4, (E,), dtype=jnp.float32)
    per_atom_energy = 0.1 * jax.random.normal(k5, (N, 1), dtype=jnp.float32)

    # Per-type parameters: symmetric 2-D sigma, scalar delta / eps.
    A = jax.random.uniform(k6, (num_types, num_types), dtype=jnp.float32,
                           minval=0.5, maxval=1.5)
    sigma_full = 0.5 * (A + A.T)
    sigma_stored = store_param(sigma_full, num_types)
    delta_stored = store_param(0.0, num_types)
    eps_stored = store_param(1.0, num_types)

    # _LJParam symmetrize + per-edge gather (indexing glue, plain JAX)
    sym_sigma = symmetrize(sigma_stored)
    sym_delta = symmetrize(delta_stored)
    sym_eps = symmetrize(eps_stored)
    types_flat = atom_types[:, 0]
    idx1 = types_flat[edge_index[0]]
    idx2 = types_flat[edge_index[1]]
    sigma_e = sym_sigma[idx1, idx2]
    delta_e = sym_delta[idx1, idx2]
    eps_e = sym_eps[idx1, idx2]
    edge_center = edge_index[0]

    for style in ("lj", "repulsive"):
        out = lennard_jones_pallas(sigma_e, delta_e, eps_e, edge_len,
                                   edge_cutoff, edge_center, num_nodes=N,
                                   per_atom_energy=per_atom_energy,
                                   exponent=exponent, lj_style=style)
        out = jax.block_until_ready(out)
        ref = reference(sigma_e, delta_e, eps_e, edge_len, edge_cutoff,
                        edge_center, per_atom_energy, N,
                        exponent=exponent, lj_style=style)
        assert out.shape == (N, 1)
        assert jnp.allclose(out, ref, rtol=5e-3, atol=1e-2), (style, out, ref)

    print("KERNEL_OK")
</pallas_src>

<mosaic_0001>
module attributes {stable_mosaic.version = 11 : i64} {
  func.func @_lj_kernel(%arg0: i32, %arg1: i32, %arg2: i32, %arg3: memref<8x128xf32, #tpu.memory_space<vmem>>, %arg4: memref<8x128xf32, #tpu.memory_space<vmem>>, %arg5: memref<8x128xf32, #tpu.memory_space<vmem>>, %arg6: memref<8x128xf32, #tpu.memory_space<vmem>>, %arg7: memref<8x128xf32, #tpu.memory_space<vmem>>, %arg8: memref<8x128xi32, #tpu.memory_space<vmem>>, %arg9: memref<8x128xf32, #tpu.memory_space<vmem>>) attributes {dimension_semantics = [#tpu.dimension_semantics<parallel>, #tpu.dimension_semantics<parallel>, #tpu.dimension_semantics<arbitrary>], iteration_bounds = array<i64: 1, 1, 1>, scalar_prefetch = 0 : i64, scratch_operands = 0 : i64, tpu.core_type = #tpu.core_type<tc>, window_params = [{transform_indices = @transform_0, window_bounds = array<i64: 8, 128>}, {transform_indices = @transform_1, window_bounds = array<i64: 8, 128>}, {transform_indices = @transform_2, window_bounds = array<i64: 8, 128>}, {transform_indices = @transform_3, window_bounds = array<i64: 8, 128>}, {transform_indices = @transform_4, window_bounds = array<i64: 8, 128>}, {transform_indices = @transform_5, window_bounds = array<i64: 8, 128>}, {transform_indices = @transform_6, window_bounds = array<i64: 8, 128>}]} {
    %c0_i32 = arith.constant 0 : i32
    %0 = arith.cmpi eq, %arg2, %c0_i32 : i32
    %1 = arith.extui %0 : i1 to i32
    %c0_i32_0 = arith.constant 0 : i32
    %2 = arith.cmpi ne, %1, %c0_i32_0 : i32
    scf.if %2 {
      %cst_49 = arith.constant 0.000000e+00 : f32
      %130 = vector.broadcast %cst_49 : f32 to vector<8x128xf32>
      %c0_50 = arith.constant 0 : index
      %c0_51 = arith.constant 0 : index
      %131 = vector.load %arg9[%c0_50, %c0_51] : memref<8x128xf32, #tpu.memory_space<vmem>>, vector<8x128xf32>
      tpu.vector_store %arg9[%c0_50, %c0_51], %130 {strides = array<i32>} : memref<8x128xf32, #tpu.memory_space<vmem>>, vector<8x128xf32>,
    } else {
    }
    %c0 = arith.constant 0 : index
    %c0_1 = arith.constant 0 : index
    %3 = vector.load %arg3[%c0, %c0_1] : memref<8x128xf32, #tpu.memory_space<vmem>>, vector<8x128xf32>
    %cst = arith.constant 0.000000e+00 : f32
    %4 = vector.broadcast %cst : f32 to vector<8x128xf32>
    %5 = arith.maximumf %3, %4 : vector<8x128xf32>
    %c0_2 = arith.constant 0 : index
    %c0_3 = arith.constant 0 : index
    %6 = vector.load %arg4[%c0_2, %c0_3] : memref<8x128xf32, #tpu.memory_space<vmem>>, vector<8x128xf32>
    %cst_4 = arith.constant 0.000000e+00 : f32
    %7 = vector.broadcast %cst_4 : f32 to vector<8x128xf32>
    %8 = arith.maximumf %6, %7 : vector<8x128xf32>
    %c0_5 = arith.constant 0 : index
    %c0_6 = arith.constant 0 : index
    %9 = vector.load %arg5[%c0_5, %c0_6] : memref<8x128xf32, #tpu.memory_space<vmem>>, vector<8x128xf32>
    %cst_7 = arith.constant 0.000000e+00 : f32
    %10 = vector.broadcast %cst_7 : f32 to vector<8x128xf32>
    %11 = arith.maximumf %9, %10 : vector<8x128xf32>
    %c0_8 = arith.constant 0 : index
    %c0_9 = arith.constant 0 : index
    %12 = vector.load %arg6[%c0_8, %c0_9] : memref<8x128xf32, #tpu.memory_space<vmem>>, vector<8x128xf32>
    %c0_10 = arith.constant 0 : index
    %c0_11 = arith.constant 0 : index
    %13 = vector.load %arg7[%c0_10, %c0_11] : memref<8x128xf32, #tpu.memory_space<vmem>>, vector<8x128xf32>
    %c0_12 = arith.constant 0 : index
    %c0_13 = arith.constant 0 : index
    %14 = vector.load %arg8[%c0_12, %c0_13] : memref<8x128xi32, #tpu.memory_space<vmem>>, vector<8x128xi32>
    %15 = arith.subf %12, %8 : vector<8x128xf32>
    %16 = tpu.reciprocal %15 : vector<8x128xf32> -> vector<8x128xf32>
    %17 = arith.mulf %5, %16 : vector<8x128xf32>
    %18 = arith.mulf %17, %17 : vector<8x128xf32>
    %19 = arith.mulf %18, %18 : vector<8x128xf32>
    %20 = arith.mulf %18, %19 : vector<8x128xf32>
    %cst_14 = arith.constant 0.000000e+00 : f32
    %21 = vector.broadcast %cst_14 : f32 to vector<8x128xf32>
    %22 = arith.subf %21, %20 : vector<8x128xf32>
    %23 = arith.mulf %22, %22 : vector<8x128xf32>
    %24 = arith.addf %22, %23 : vector<8x128xf32>
    %cst_15 = arith.constant 2.000000e+00 : f32
    %25 = vector.broadcast %cst_15 : f32 to vector<8x128xf32>
    %26 = arith.mulf %25, %11 : vector<8x128xf32>
    %27 = arith.mulf %26, %24 : vector<8x128xf32>
    %28 = arith.mulf %27, %13 : vector<8x128xf32>
    %29 = arith.truncf %28 : vector<8x128xf32> to vector<8x128xbf16>
    %c128_i32 = arith.constant 128 : i32
    %30 = arith.muli %arg1, %c128_i32 : i32
    %31 = tpu.iota {dimensions = array<i32: 0>} : vector<128x1xi32>
    %32 = vector.broadcast %30 : i32 to vector<128x1xi32>
    %33 = arith.addi %32, %31 : vector<128x1xi32>
    %34 = vector.extract_strided_slice %14 {offsets = [0, 0], sizes = [1, 128], strides = [1, 1]} : vector<8x128xi32> to vector<1x128xi32>
    %35 = vector.broadcast %33 : vector<128x1xi32> to vector<128x128xi32>
    %36 = vector.broadcast %34 : vector<1x128xi32> to vector<128x128xi32>
    %37 = arith.cmpi eq, %35, %36 : vector<128x128xi32>
    %38 = arith.extui %37 : vector<128x128xi1> to vector<128x128xi32>
    %39 = arith.sitofp %38 : vector<128x128xi32> to vector<128x128xf32>
    %40 = arith.truncf %39 : vector<128x128xf32> to vector<128x128xbf16>
    %41 = vector.extract_strided_slice %29 {offsets = [0, 0], sizes = [1, 128], strides = [1, 1]} : vector<8x128xbf16> to vector<1x128xbf16>
    %cst_16 = arith.constant dense<0.000000e+00> : vector<1x128xf32>
    %42 = tpu.matmul %41, %40, %cst_16 {dimension_numbers = #tpu.dot_dimension_numbers<[1], [1], [0], [0], [0, 0, 1, 0], [], []>} : vector<1x128xbf16>, vector<128x128xbf16>, vector<1x128xf32> -> vector<1x128xf32>
    %c0_17 = arith.constant 0 : index
    %c0_18 = arith.constant 0 : index
    %43 = vector.load %arg9[%c0_17, %c0_18] : memref<8x128xf32, #tpu.memory_space<vmem>>, vector<1x128xf32>
    %44 = arith.addf %43, %42 : vector<1x128xf32>
    %c0_19 = arith.constant 0 : index
    %c0_20 = arith.constant 0 : index
    %45 = vector.load %arg9[%c0_19, %c0_20] : memref<8x128xf32, #tpu.memory_space<vmem>>, vector<1x128xf32>
    tpu.vector_store %arg9[%c0_19, %c0_20], %44 {strides = array<i32>} : memref<8x128xf32, #tpu.memory_space<vmem>>, vector<1x128xf32>,
    %46 = vector.extract_strided_slice %14 {offsets = [1, 0], sizes = [1, 128], strides = [1, 1]} : vector<8x128xi32> to vector<1x128xi32>
    %47 = vector.broadcast %33 : vector<128x1xi32> to vector<128x128xi32>
    %48 = vector.broadcast %46 : vector<1x128xi32> to vector<128x128xi32>
    %49 = arith.cmpi eq, %47, %48 : vector<128x128xi32>
    %50 = arith.extui %49 : vector<128x128xi1> to vector<128x128xi32>
    %51 = arith.sitofp %50 : vector<128x128xi32> to vector<128x128xf32>
    %52 = arith.truncf %51 : vector<128x128xf32> to vector<128x128xbf16>
    %53 = vector.extract_strided_slice %29 {offsets = [1, 0], sizes = [1, 128], strides = [1, 1]} : vector<8x128xbf16> to vector<1x128xbf16>
    %cst_21 = arith.constant dense<0.000000e+00> : vector<1x128xf32>
    %54 = tpu.matmul %53, %52, %cst_21 {dimension_numbers = #tpu.dot_dimension_numbers<[1], [1], [0], [0], [0, 0, 1, 0], [], []>} : vector<1x128xbf16>, vector<128x128xbf16>, vector<1x128xf32> -> vector<1x128xf32>
    %c1 = arith.constant 1 : index
    %c0_22 = arith.constant 0 : index
    %55 = vector.load %arg9[%c1, %c0_22] : memref<8x128xf32, #tpu.memory_space<vmem>>, vector<1x128xf32>
    %56 = arith.addf %55, %54 : vector<1x128xf32>
    %c1_23 = arith.constant 1 : index
    %c0_24 = arith.constant 0 : index
    %57 = vector.load %arg9[%c1_23, %c0_24] : memref<8x128xf32, #tpu.memory_space<vmem>>, vector<1x128xf32>
    tpu.vector_store %arg9[%c1_23, %c0_24], %56 {strides = array<i32>} : memref<8x128xf32, #tpu.memory_space<vmem>>, vector<1x128xf32>,
    %58 = vector.extract_strided_slice %14 {offsets = [2, 0], sizes = [1, 128], strides = [1, 1]} : vector<8x128xi32> to vector<1x128xi32>
    %59 = vector.broadcast %33 : vector<128x1xi32> to vector<128x128xi32>
    %60 = vector.broadcast %58 : vector<1x128xi32> to vector<128x128xi32>
    %61 = arith.cmpi eq, %59, %60 : vector<128x128xi32>
    %62 = arith.extui %61 : vector<128x128xi1> to vector<128x128xi32>
    %63 = arith.sitofp %62 : vector<128x128xi32> to vector<128x128xf32>
    %64 = arith.truncf %63 : vector<128x128xf32> to vector<128x128xbf16>
    %65 = vector.extract_strided_slice %29 {offsets = [2, 0], sizes = [1, 128], strides = [1, 1]} : vector<8x128xbf16> to vector<1x128xbf16>
    %cst_25 = arith.constant dense<0.000000e+00> : vector<1x128xf32>
    %66 = tpu.matmul %65, %64, %cst_25 {dimension_numbers = #tpu.dot_dimension_numbers<[1], [1], [0], [0], [0, 0, 1, 0], [], []>} : vector<1x128xbf16>, vector<128x128xbf16>, vector<1x128xf32> -> vector<1x128xf32>
    %c2 = arith.constant 2 : index
    %c0_26 = arith.constant 0 : index
    %67 = vector.load %arg9[%c2, %c0_26] : memref<8x128xf32, #tpu.memory_space<vmem>>, vector<1x128xf32>
    %68 = arith.addf %67, %66 : vector<1x128xf32>
    %c2_27 = arith.constant 2 : index
    %c0_28 = arith.constant 0 : index
    %69 = vector.load %arg9[%c2_27, %c0_28] : memref<8x128xf32, #tpu.memory_space<vmem>>, vector<1x128xf32>
    tpu.vector_store %arg9[%c2_27, %c0_28], %68 {strides = array<i32>} : memref<8x128xf32, #tpu.memory_space<vmem>>, vector<1x128xf32>,
    %70 = vector.extract_strided_slice %14 {offsets = [3, 0], sizes = [1, 128], strides = [1, 1]} : vector<8x128xi32> to vector<1x128xi32>
    %71 = vector.broadcast %33 : vector<128x1xi32> to vector<128x128xi32>
    %72 = vector.broadcast %70 : vector<1x128xi32> to vector<128x128xi32>
    %73 = arith.cmpi eq, %71, %72 : vector<128x128xi32>
    %74 = arith.extui %73 : vector<128x128xi1> to vector<128x128xi32>
    %75 = arith.sitofp %74 : vector<128x128xi32> to vector<128x128xf32>
    %76 = arith.truncf %75 : vector<128x128xf32> to vector<128x128xbf16>
    %77 = vector.extract_strided_slice %29 {offsets = [3, 0], sizes = [1, 128], strides = [1, 1]} : vector<8x128xbf16> to vector<1x128xbf16>
    %cst_29 = arith.constant dense<0.000000e+00> : vector<1x128xf32>
    %78 = tpu.matmul %77, %76, %cst_29 {dimension_numbers = #tpu.dot_dimension_numbers<[1], [1], [0], [0], [0, 0, 1, 0], [], []>} : vector<1x128xbf16>, vector<128x128xbf16>, vector<1x128xf32> -> vector<1x128xf32>
    %c3 = arith.constant 3 : index
    %c0_30 = arith.constant 0 : index
    %79 = vector.load %arg9[%c3, %c0_30] : memref<8x128xf32, #tpu.memory_space<vmem>>, vector<1x128xf32>
    %80 = arith.addf %79, %78 : vector<1x128xf32>
    %c3_31 = arith.constant 3 : index
    %c0_32 = arith.constant 0 : index
    %81 = vector.load %arg9[%c3_31, %c0_32] : memref<8x128xf32, #tpu.memory_space<vmem>>, vector<1x128xf32>
    tpu.vector_store %arg9[%c3_31, %c0_32], %80 {strides = array<i32>} : memref<8x128xf32, #tpu.memory_space<vmem>>, vector<1x128xf32>,
    %82 = vector.extract_strided_slice %14 {offsets = [4, 0], sizes = [1, 128], strides = [1, 1]} : vector<8x128xi32> to vector<1x128xi32>
    %83 = vector.broadcast %33 : vector<128x1xi32> to vector<128x128xi32>
    %84 = vector.broadcast %82 : vector<1x128xi32> to vector<128x128xi32>
    %85 = arith.cmpi eq, %83, %84 : vector<128x128xi32>
    %86 = arith.extui %85 : vector<128x128xi1> to vector<128x128xi32>
    %87 = arith.sitofp %86 : vector<128x128xi32> to vector<128x128xf32>
    %88 = arith.truncf %87 : vector<128x128xf32> to vector<128x128xbf16>
    %89 = vector.extract_strided_slice %29 {offsets = [4, 0], sizes = [1, 128], strides = [1, 1]} : vector<8x128xbf16> to vector<1x128xbf16>
    %cst_33 = arith.constant dense<0.000000e+00> : vector<1x128xf32>
    %90 = tpu.matmul %89, %88, %cst_33 {dimension_numbers = #tpu.dot_dimension_numbers<[1], [1], [0], [0], [0, 0, 1, 0], [], []>} : vector<1x128xbf16>, vector<128x128xbf16>, vector<1x128xf32> -> vector<1x128xf32>
    %c4 = arith.constant 4 : index
    %c0_34 = arith.constant 0 : index
    %91 = vector.load %arg9[%c4, %c0_34] : memref<8x128xf32, #tpu.memory_space<vmem>>, vector<1x128xf32>
    %92 = arith.addf %91, %90 : vector<1x128xf32>
    %c4_35 = arith.constant 4 : index
    %c0_36 = arith.constant 0 : index
    %93 = vector.load %arg9[%c4_35, %c0_36] : memref<8x128xf32, #tpu.memory_space<vmem>>, vector<1x128xf32>
    tpu.vector_store %arg9[%c4_35, %c0_36], %92 {strides = array<i32>} : memref<8x128xf32, #tpu.memory_space<vmem>>, vector<1x128xf32>,
    %94 = vector.extract_strided_slice %14 {offsets = [5, 0], sizes = [1, 128], strides = [1, 1]} : vector<8x128xi32> to vector<1x128xi32>
    %95 = vector.broadcast %33 : vector<128x1xi32> to vector<128x128xi32>
    %96 = vector.broadcast %94 : vector<1x128xi32> to vector<128x128xi32>
    %97 = arith.cmpi eq, %95, %96 : vector<128x128xi32>
    %98 = arith.extui %97 : vector<128x128xi1> to vector<128x128xi32>
    %99 = arith.sitofp %98 : vector<128x128xi32> to vector<128x128xf32>
    %100 = arith.truncf %99 : vector<128x128xf32> to vector<128x128xbf16>
    %101 = vector.extract_strided_slice %29 {offsets = [5, 0], sizes = [1, 128], strides = [1, 1]} : vector<8x128xbf16> to vector<1x128xbf16>
    %cst_37 = arith.constant dense<0.000000e+00> : vector<1x128xf32>
    %102 = tpu.matmul %101, %100, %cst_37 {dimension_numbers = #tpu.dot_dimension_numbers<[1], [1], [0], [0], [0, 0, 1, 0], [], []>} : vector<1x128xbf16>, vector<128x128xbf16>, vector<1x128xf32> -> vector<1x128xf32>
    %c5 = arith.constant 5 : index
    %c0_38 = arith.constant 0 : index
    %103 = vector.load %arg9[%c5, %c0_38] : memref<8x128xf32, #tpu.memory_space<vmem>>, vector<1x128xf32>
    %104 = arith.addf %103, %102 : vector<1x128xf32>
    %c5_39 = arith.constant 5 : index
    %c0_40 = arith.constant 0 : index
    %105 = vector.load %arg9[%c5_39, %c0_40] : memref<8x128xf32, #tpu.memory_space<vmem>>, vector<1x128xf32>
    tpu.vector_store %arg9[%c5_39, %c0_40], %104 {strides = array<i32>} : memref<8x128xf32, #tpu.memory_space<vmem>>, vector<1x128xf32>,
    %106 = vector.extract_strided_slice %14 {offsets = [6, 0], sizes = [1, 128], strides = [1, 1]} : vector<8x128xi32> to vector<1x128xi32>
    %107 = vector.broadcast %33 : vector<128x1xi32> to vector<128x128xi32>
    %108 = vector.broadcast %106 : vector<1x128xi32> to vector<128x128xi32>
    %109 = arith.cmpi eq, %107, %108 : vector<128x128xi32>
    %110 = arith.extui %109 : vector<128x128xi1> to vector<128x128xi32>
    %111 = arith.sitofp %110 : vector<128x128xi32> to vector<128x128xf32>
    %112 = arith.truncf %111 : vector<128x128xf32> to vector<128x128xbf16>
    %113 = vector.extract_strided_slice %29 {offsets = [6, 0], sizes = [1, 128], strides = [1, 1]} : vector<8x128xbf16> to vector<1x128xbf16>
    %cst_41 = arith.constant dense<0.000000e+00> : vector<1x128xf32>
    %114 = tpu.matmul %113, %112, %cst_41 {dimension_numbers = #tpu.dot_dimension_numbers<[1], [1], [0], [0], [0, 0, 1, 0], [], []>} : vector<1x128xbf16>, vector<128x128xbf16>, vector<1x128xf32> -> vector<1x128xf32>
    %c6 = arith.constant 6 : index
    %c0_42 = arith.constant 0 : index
    %115 = vector.load %arg9[%c6, %c0_42] : memref<8x128xf32, #tpu.memory_space<vmem>>, vector<1x128xf32>
    %116 = arith.addf %115, %114 : vector<1x128xf32>
    %c6_43 = arith.constant 6 : index
    %c0_44 = arith.constant 0 : index
    %117 = vector.load %arg9[%c6_43, %c0_44] : memref<8x128xf32, #tpu.memory_space<vmem>>, vector<1x128xf32>
    tpu.vector_store %arg9[%c6_43, %c0_44], %116 {strides = array<i32>} : memref<8x128xf32, #tpu.memory_space<vmem>>, vector<1x128xf32>,
    %118 = vector.extract_strided_slice %14 {offsets = [7, 0], sizes = [1, 128], strides = [1, 1]} : vector<8x128xi32> to vector<1x128xi32>
    %119 = vector.broadcast %33 : vector<128x1xi32> to vector<128x128xi32>
    %120 = vector.broadcast %118 : vector<1x128xi32> to vector<128x128xi32>
    %121 = arith.cmpi eq, %119, %120 : vector<128x128xi32>
    %122 = arith.extui %121 : vector<128x128xi1> to vector<128x128xi32>
    %123 = arith.sitofp %122 : vector<128x128xi32> to vector<128x128xf32>
    %124 = arith.truncf %123 : vector<128x128xf32> to vector<128x128xbf16>
    %125 = vector.extract_strided_slice %29 {offsets = [7, 0], sizes = [1, 128], strides = [1, 1]} : vector<8x128xbf16> to vector<1x128xbf16>
    %cst_45 = arith.constant dense<0.000000e+00> : vector<1x128xf32>
    %126 = tpu.matmul %125, %124, %cst_45 {dimension_numbers = #tpu.dot_dimension_numbers<[1], [1], [0], [0], [0, 0, 1, 0], [], []>} : vector<1x128xbf16>, vector<128x128xbf16>, vector<1x128xf32> -> vector<1x128xf32>
    %c7 = arith.constant 7 : index
    %c0_46 = arith.constant 0 : index
    %127 = vector.load %arg9[%c7, %c0_46] : memref<8x128xf32, #tpu.memory_space<vmem>>, vector<1x128xf32>
    %128 = arith.addf %127, %126 : vector<1x128xf32>
    %c7_47 = arith.constant 7 : index
    %c0_48 = arith.constant 0 : index
    %129 = vector.load %arg9[%c7_47, %c0_48] : memref<8x128xf32, #tpu.memory_space<vmem>>, vector<1x128xf32>
    tpu.vector_store %arg9[%c7_47, %c0_48], %128 {strides = array<i32>} : memref<8x128xf32, #tpu.memory_space<vmem>>, vector<1x128xf32>,
    return
  }
  func.func @transform_0(%arg0: i32, %arg1: i32, %arg2: i32) -> (i32, i32) {
    %c1_i32 = arith.constant 1 : i32
    %0 = arith.muli %arg0, %c1_i32 : i32
    %1 = arith.addi %0, %arg2 : i32
    %c0_i32 = arith.constant 0 : i32
    %c0_i32_0 = arith.constant 0 : i32
    return %1, %c0_i32 : i32, i32
  }
  func.func @transform_1(%arg0: i32, %arg1: i32, %arg2: i32) -> (i32, i32) {
    %c1_i32 = arith.constant 1 : i32
    %0 = arith.muli %arg0, %c1_i32 : i32
    %1 = arith.addi %0, %arg2 : i32
    %c0_i32 = arith.constant 0 : i32
    %c0_i32_0 = arith.constant 0 : i32
    return %1, %c0_i32 : i32, i32
  }
  func.func @transform_2(%arg0: i32, %arg1: i32, %arg2: i32) -> (i32, i32) {
    %c1_i32 = arith.constant 1 : i32
    %0 = arith.muli %arg0, %c1_i32 : i32
    %1 = arith.addi %0, %arg2 : i32
    %c0_i32 = arith.constant 0 : i32
    %c0_i32_0 = arith.constant 0 : i32
    return %1, %c0_i32 : i32, i32
  }
  func.func @transform_3(%arg0: i32, %arg1: i32, %arg2: i32) -> (i32, i32) {
    %c1_i32 = arith.constant 1 : i32
    %0 = arith.muli %arg0, %c1_i32 : i32
    %1 = arith.addi %0, %arg2 : i32
    %c0_i32 = arith.constant 0 : i32
    %c0_i32_0 = arith.constant 0 : i32
    return %1, %c0_i32 : i32, i32
  }
  func.func @transform_4(%arg0: i32, %arg1: i32, %arg2: i32) -> (i32, i32) {
    %c1_i32 = arith.constant 1 : i32
    %0 = arith.muli %arg0, %c1_i32 : i32
    %1 = arith.addi %0, %arg2 : i32
    %c0_i32 = arith.constant 0 : i32
    %c0_i32_0 = arith.constant 0 : i32
    return %1, %c0_i32 : i32, i32
  }
  func.func @transform_5(%arg0: i32, %arg1: i32, %arg2: i32) -> (i32, i32) {
    %c1_i32 = arith.constant 1 : i32
    %0 = arith.muli %arg0, %c1_i32 : i32
    %1 = arith.addi %0, %arg2 : i32
    %c0_i32 = arith.constant 0 : i32
    %c0_i32_0 = arith.constant 0 : i32
    return %1, %c0_i32 : i32, i32
  }
  func.func @transform_6(%arg0: i32, %arg1: i32, %arg2: i32) -> (i32, i32) {
    %c0_i32 = arith.constant 0 : i32
    return %arg0, %arg1 : i32, i32
  }
}

</mosaic_0001>

<bundles_post_ra>
// kernel: tpu_custom_call.1
= control target key start
LH: loop header
LB: loop body
LE: loop exit
PB: predicated region body
PF: predicated region fallthrough
CT: control target
= control target key end

     0   :  { %11 = vsyncpa [#allocation3], 0  ;;  %s1773_s0 = inlined_call_operand.hbm [shape: f32[8,128], index: 0, kind: input, shape index: {}]   ;;  %s1774_s1 = inlined_call_operand.hbm [shape: f32[8,128], index: 1, kind: input, shape index: {}]   ;;  %s1775_s2 = inlined_call_operand.hbm [shape: f32[8,128], index: 2, kind: input, shape index: {}]   ;;  %s1776_s3 = inlined_call_operand.hbm [shape: f32[8,128], index: 3, kind: input, shape index: {}]   ;;  %s1777_s4 = inlined_call_operand.hbm [shape: f32[8,128], index: 4, kind: input, shape index: {}]   ;;  %s1778_s5 = inlined_call_operand.hbm [shape: s32[8,128], index: 5, kind: input, shape index: {}]   ;;  %s1779_s6 = inlined_call_operand.hbm [shape: f32[8,128], index: 6, kind: output, shape index: {}]  }
   0x1   :  { %12 = vsyncpa [#allocation6], 0 }
   0x2   :  { %13 = vsyncpa [#allocation9], 0 }
   0x3   :  { %14 = vsyncpa [#allocation12], 0  ;;  %s38_s23 = sshll.u32 %s1774_s1, 4  ;;  %s39_s23 = int_to_ptr.hbm [resolvable:$true] %s38_s23 }
   0x4   :  { %15 = vsyncpa [#allocation4], 0  ;;  %s1273_s24 = smov [#allocation5]   ;;  %s66_s28 = sshll.u32 %s1776_s3, 4  ;;  %s67_s28 = int_to_ptr.hbm [resolvable:$true] %s66_s28 }
   0x5   :  { %s40_s25 = sshll.u32 %s1273_s24, 4  ;;  %s1274_s29 = smov [#allocation8]   ;;  %s41_s25 = int_to_ptr.vmem [resolvable:$true] %s40_s25 }
   0x6   :  { %43 = dma.hbm_to_vmem [thread:$0]  %s39_s23, 128, %s41_s25, [#allocation6]  }
   0x7   :  { %s68_s30 = sshll.u32 %s1274_s29, 4  ;;  %s24_s9 = sshll.u32 %s1773_s0, 4  ;;  %s69_s30 = int_to_ptr.vmem [resolvable:$true] %s68_s30  ;;  %s25_s9 = int_to_ptr.hbm [resolvable:$true] %s24_s9 }
   0x8   :  { %71 = dma.hbm_to_vmem [thread:$0]  %s67_s28, 128, %s69_s30, [#allocation9]  }
   0x9   :  { %s52_s11 = sshll.u32 %s1775_s2, 4  ;;  %s1275_s12 = smov [#allocation2]   ;;  %s53_s11 = int_to_ptr.hbm [resolvable:$true] %s52_s11 }
   0xa   :  { %s26_s13 = sshll.u32 %s1275_s12, 4  ;;  %s1276_s3 = smov [#allocation7]   ;;  %s27_s13 = int_to_ptr.vmem [resolvable:$true] %s26_s13 }
   0xb   :  { %29 = dma.hbm_to_vmem [thread:$0]  %s25_s9, 128, %s27_s13, [#allocation3]  }
   0xc   :  { %s54_s14 = sshll.u32 %s1276_s3, 4  ;;  %s80_s17 = sshll.u32 %s1777_s4, 4  ;;  %s55_s14 = int_to_ptr.vmem [resolvable:$true] %s54_s14  ;;  %s81_s17 = int_to_ptr.hbm [resolvable:$true] %s80_s17 }
   0xd   :  { %57 = dma.hbm_to_vmem [thread:$0]  %s53_s11, 128, %s55_s14, [#allocation6]  }
   0xe   :  { %s94_s19 = sshll.u32 %s1778_s5, 4  ;;  %s1277_s20 = smov [#allocation10]   ;;  %s95_s19 = int_to_ptr.hbm [resolvable:$true] %s94_s19 }
   0xf   :  { %s82_s2 = sshll.u32 %s1277_s20, 4  ;;  %s1278_s21 = smov [#allocation11]   ;;  %s83_s2 = int_to_ptr.vmem [resolvable:$true] %s82_s2 }
  0x10   :  { %85 = dma.hbm_to_vmem [thread:$0]  %s81_s17, 128, %s83_s2, [#allocation9]  }
  0x11   :  { %s96_s22 = sshll.u32 %s1278_s21, 4  ;;  %s97_s22 = int_to_ptr.vmem [resolvable:$true] %s96_s22 }
  0x12   :  { %99 = dma.hbm_to_vmem [thread:$0]  %s95_s19, 128, %s97_s22, [#allocation12]  }
  0x13   :  { %1263 = dma.done.wait [#allocation3], 128  }
  0x14   :  { %1264 = vsyncadd [#allocation3], 4294967168 }
  0x15   :  { %1265 = dma.done.wait [#allocation6], 256  }
  0x16   :  { %1266 = vsyncadd [#allocation6], 4294967040 }
  0x17   :  { %1267 = dma.done.wait [#allocation9], 256  }
  0x18   :  { %1268 = vsyncadd [#allocation9], 4294967040 }
  0x19   :  { %1269 = dma.done.wait [#allocation12], 128  }
  0x1a   :  { %1270 = vsyncadd [#allocation12], 4294967168  ;;  %v171_v0 = vlaneseq  ;;  %v1343_v4 = vld [vmem:[#allocation11] sm:$0xff]  ;;  %v1279_v11 = vmov 1.0|1.0   ;;  %v141_v18 = vld [vmem:[#allocation8] sm:$0xff] }
  0x1b   :  { %v1346_v5 = vperm.slane %v1343_v4, 0  ;;  %v1349_v6 = vperm.slane %v1343_v4, 1  ;;  %v1352_v7 = vperm.slane %v1343_v4, 2  ;;  %v1355_v8 = vperm.slane %v1343_v4, 3  ;;  %v137_v16 = vld [vmem:[#allocation5] sm:$0xff]  ;;  %v135_v30 = vld [vmem:[#allocation2] sm:$0xff] }
  0x1c   :  { %v1335_v1 = vshrl.u32 %v171_v0, 7  ;;  %v138_v17 = vmax.f32 %v137_v16, 0.0  ;;  %v136_v35 = vmax.f32 %v135_v30, 0.0  ;;  %v1537_v41 = vperm.slane %v1343_v4, 4  ;;  %v139_v43 = vld [vmem:[#allocation7] sm:$0xff]  ;;  %v142_v57 = vld [vmem:[#allocation10] sm:$0xff] }
  0x1d   :  { %v1545_v42 = vperm.slane %v1343_v4, 5  ;;  %v1553_v45 = vperm.slane %v1343_v4, 6  ;;  %v1568_v47 = vperm.slane %v1343_v4, 7  ;;  %v140_v49 = vmax.f32 %v139_v43, 0.0  ;;  %s1281_s4 = smov [#allocation13]   ;;  %s815_s25 = sshll.u32 %s1779_s6, 4  ;;  %s816_s25 = int_to_ptr.hbm [resolvable:$true] %s815_s25 }
  0x1e   :  { %v1338_v2 = vadd.s32 112, %v1335_v1  ;;  %v1341_v3 = vadd.s32 120, %v1335_v1  ;;  %v1358_v9 = vadd.s32 96, %v1335_v1  ;;  %v1361_v10 = vadd.s32 104, %v1335_v1  ;;  %s813_s5 = sshll.u32 %s1281_s4, 4  ;;  %s814_s5 = int_to_ptr.vmem [resolvable:$true] %s813_s5 }
  0x1f   :  { %v1400_v12 = vadd.s32 80, %v1335_v1  ;;  %v1403_v13 = vadd.s32 88, %v1335_v1  ;;  %v1426_v14 = vadd.s32 64, %v1335_v1  ;;  %v1429_v15 = vadd.s32 72, %v1335_v1 }
  0x20   :  { %vm220_vm0 = vcmp.eq.s32.totalorder %v1338_v2, %v1346_v5  ;;  %vm221_vm1 = vcmp.eq.s32.totalorder %v1341_v3, %v1346_v5  ;;  %vm293_vm2 = vcmp.eq.s32.totalorder %v1338_v2, %v1349_v6  ;;  %vm294_vm3 = vcmp.eq.s32.totalorder %v1341_v3, %v1349_v6 }
  0x21   :  { %vm844_vm4 = vmpackc.low %vm221_vm1, %vm220_vm0  ;;  %vm373_vm5 = vcmp.eq.s32.totalorder %v1338_v2, %v1352_v7  ;;  %vm374_vm6 = vcmp.eq.s32.totalorder %v1341_v3, %v1352_v7  ;;  %vm448_vm7 = vcmp.eq.s32.totalorder %v1338_v2, %v1355_v8  ;;  %vm449_vm8 = vcmp.eq.s32.totalorder %v1341_v3, %v1355_v8 }
  0x22   :  { %845 = vmatpush.bf16.xpose.msk.msra.mxu0 %vm844_vm4, %v1279_v11  ;;  %vm876_vm9 = vmpackc.low %vm294_vm3, %vm293_vm2  ;;  %vm218_vm12 = vcmp.eq.s32.totalorder %v1358_v9, %v1346_v5  ;;  %vm219_vm13 = vcmp.eq.s32.totalorder %v1361_v10, %v1346_v5  ;;  %vm291_vm14 = vcmp.eq.s32.totalorder %v1358_v9, %v1349_v6  ;;  %vm292_vm15 = vcmp.eq.s32.totalorder %v1361_v10, %v1349_v6 }
  0x23   :  { %877 = vmatpush.bf16.xpose.msk.msra.mxu1 %vm876_vm9, %v1279_v11  ;;  %vm908_vm10 = vmpackc.low %vm374_vm6, %vm373_vm5  ;;  %vm371_vm0 = vcmp.eq.s32.totalorder %v1358_v9, %v1352_v7  ;;  %vm372_vm1 = vcmp.eq.s32.totalorder %v1361_v10, %v1352_v7  ;;  %vm446_vm3 = vcmp.eq.s32.totalorder %v1358_v9, %v1355_v8  ;;  %vm447_vm4 = vcmp.eq.s32.totalorder %v1361_v10, %v1355_v8 }
  0x24   :  { %909 = vmatpush.bf16.xpose.msk.msra.mxu2 %vm908_vm10, %v1279_v11  ;;  %vm940_vm11 = vmpackc.low %vm449_vm8, %vm448_vm7  ;;  %vm216_vm8 = vcmp.eq.s32.totalorder %v1400_v12, %v1346_v5  ;;  %vm217_vm9 = vcmp.eq.s32.totalorder %v1403_v13, %v1346_v5  ;;  %vm289_vm10 = vcmp.eq.s32.totalorder %v1400_v12, %v1349_v6  ;;  %v144_v19 = vsub.f32 %v141_v18, %v138_v17 }
  0x25   :  { %941 = vmatpush.bf16.xpose.msk.msra.mxu3 %vm940_vm11, %v1279_v11  ;;  %vm846_vm2 = vmpackc.low %vm219_vm13, %vm218_vm12  ;;  %vm290_vm11 = vcmp.eq.s32.totalorder %v1403_v13, %v1349_v6  ;;  %vm369_vm12 = vcmp.eq.s32.totalorder %v1400_v12, %v1352_v7  ;;  %vm370_vm13 = vcmp.eq.s32.totalorder %v1403_v13, %v1352_v7  ;;  %v1452_v20 = vadd.s32 48, %v1335_v1 }
  0x26   :  { %vm878_vm5 = vmpackc.low %vm292_vm15, %vm291_vm14  ;;  %vm444_vm15 = vcmp.eq.s32.totalorder %v1400_v12, %v1355_v8  ;;  %v1455_v21 = vadd.s32 56, %v1335_v1  ;;  %1093 = vrcp.f32 %v144_v19  ;;  %v1478_v23 = vadd.s32 32, %v1335_v1 }
  0x27   :  { %vm910_vm6 = vmpackc.low %vm372_vm1, %vm371_vm0  ;;  %vm445_vm0 = vcmp.eq.s32.totalorder %v1403_v13, %v1355_v8  ;;  %v1481_v24 = vadd.s32 40, %v1335_v1  ;;  %v154_v28 = vand.u32 2147483647, %v144_v19  ;;  %v156_v29 = vand.u32 2147483648, %v144_v19 }
  0x28   :  { %vm942_vm7 = vmpackc.low %vm447_vm4, %vm446_vm3  ;;  %vm214_vm4 = vcmp.eq.s32.totalorder %v1426_v14, %v1346_v5  ;;  %v1504_v32 = vadd.s32 16, %v1335_v1  ;;  %v1507_v33 = vadd.s32 24, %v1335_v1  ;;  %v1522_v37 = vadd.s32 8, %v1335_v1 }
  0x29   :  { %vm848_vm14 = vmpackc.low %vm217_vm9, %vm216_vm8  ;;  %vm367_vm8 = vcmp.eq.s32.totalorder %v1426_v14, %v1352_v7  ;;  %vm368_vm9 = vcmp.eq.s32.totalorder %v1429_v15, %v1352_v7  ;;  %v157_v34 = vor.u32 1.1754944e-38, %v156_v29  ;;  %v166_v55 = vmul.f32 2.0, %v140_v49 }
  0x2a   :  { %847 = vmatpush.bf16.xpose.msk.msra.mxu0 %vm846_vm2, %v1279_v11  ;;  %vm880_vm1 = vmpackc.low %vm290_vm11, %vm289_vm10  ;;  %vm442_vm11 = vcmp.eq.s32.totalorder %v1426_v14, %v1355_v8 }
  0x2b   :  { %879 = vmatpush.bf16.xpose.msk.msra.mxu1 %vm878_vm5, %v1279_v11  ;;  %vm912_vm2 = vmpackc.low %vm370_vm13, %vm369_vm12  ;;  %vm215_vm5 = vcmp.eq.s32.totalorder %v1429_v15, %v1346_v5  ;;  %vm443_vm12 = vcmp.eq.s32.totalorder %v1429_v15, %v1355_v8 }
  0x2c   :  { %911 = vmatpush.bf16.xpose.msk.msra.mxu2 %vm910_vm6, %v1279_v11  ;;  %vm944_vm3 = vmpackc.low %vm445_vm0, %vm444_vm15  ;;  %vm287_vm6 = vcmp.eq.s32.totalorder %v1426_v14, %v1349_v6  ;;  %vm212_vm0 = vcmp.eq.s32.totalorder %v1452_v20, %v1346_v5  ;;  %v1094_v22 = vpop.eup %1093 }
  0x2d   :  { %943 = vmatpush.bf16.xpose.msk.msra.mxu3 %vm942_vm7, %v1279_v11  ;;  %vm288_vm7 = vcmp.eq.s32.totalorder %v1429_v15, %v1349_v6  ;;  %vm850_vm10 = vmpackc.low %vm215_vm5, %vm214_vm4  ;;  %vm365_vm4 = vcmp.eq.s32.totalorder %v1452_v20, %v1352_v7  ;;  %vm366_vm5 = vcmp.eq.s32.totalorder %v1455_v21, %v1352_v7  ;;  %v146_v25 = vmul.f32 %v1094_v22, %v144_v19 }
  0x2e   :  { %vm882_vm13 = vmpackc.low %vm288_vm7, %vm287_vm6  ;;  %vm440_vm7 = vcmp.eq.s32.totalorder %v1452_v20, %v1355_v8 }
  0x2f   :  { %vm946_vm15 = vmpackc.low %vm443_vm12, %vm442_vm11  ;;  %v147_v26 = vsub.f32 1.0, %v146_v25  ;;  %vm210_vm12 = vcmp.eq.s32.totalorder %v1478_v23, %v1346_v5 }
  0x31   :  { %v148_v27 = vmul.f32 %v1094_v22, %v147_v26 }
  0x32   :  { %849 = vmatpush.bf16.xpose.msk.msra.mxu0 %vm848_vm14, %v1279_v11  ;;  %vm914_vm14 = vmpackc.low %vm368_vm9, %vm367_vm8  ;;  %vm441_vm8 = vcmp.eq.s32.totalorder %v1455_v21, %v1355_v8 }
  0x33   :  { %881 = vmatpush.bf16.xpose.msk.msra.mxu1 %vm880_vm1, %v1279_v11  ;;  %vm213_vm1 = vcmp.eq.s32.totalorder %v1455_v21, %v1346_v5  ;;  %vm948_vm11 = vmpackc.low %vm441_vm8, %vm440_vm7  ;;  %v149_v31 = vadd.f32 %v1094_v22, %v148_v27  ;;  %vm151_vm7 = vweird.f32 %v1094_v22 }
  0x34   :  { %913 = vmatpush.bf16.xpose.msk.msra.mxu2 %vm912_vm2, %v1279_v11  ;;  %vm285_vm2 = vcmp.eq.s32.totalorder %v1452_v20, %v1349_v6  ;;  %vm852_vm6 = vmpackc.low %vm213_vm1, %vm212_vm0  ;;  %vm363_vm0 = vcmp.eq.s32.totalorder %v1478_v23, %v1352_v7  ;;  %vm364_vm1 = vcmp.eq.s32.totalorder %v1481_v24, %v1352_v7 }
  0x35   :  { %945 = vmatpush.bf16.xpose.msk.msra.mxu3 %vm944_vm3, %v1279_v11  ;;  %vm286_vm3 = vcmp.eq.s32.totalorder %v1455_v21, %v1349_v6  ;;  %vm918_vm8 = vmpackc.low %vm364_vm1, %vm363_vm0  ;;  %vm361_vm0 = vcmp.eq.s32.totalorder %v1504_v32, %v1352_v7  ;;  %vm362_vm1 = vcmp.eq.s32.totalorder %v1507_v33, %v1352_v7 }
  0x36   :  { %vm884_vm9 = vmpackc.low %vm286_vm3, %vm285_vm2  ;;  %vm438_vm3 = vcmp.eq.s32.totalorder %v1478_v23, %v1355_v8 }
  0x3a   :  { %851 = vmatpush.bf16.xpose.msk.msra.mxu0 %vm850_vm10, %v1279_v11  ;;  %vm916_vm10 = vmpackc.low %vm366_vm5, %vm365_vm4  ;;  %vm439_vm4 = vcmp.eq.s32.totalorder %v1481_v24, %v1355_v8 }
  0x3b   :  { %883 = vmatpush.bf16.xpose.msk.msra.mxu1 %vm882_vm13, %v1279_v11  ;;  %vm211_vm13 = vcmp.eq.s32.totalorder %v1481_v24, %v1346_v5 }
  0x3c   :  { %915 = vmatpush.bf16.xpose.msk.msra.mxu2 %vm914_vm14, %v1279_v11  ;;  %vm283_vm14 = vcmp.eq.s32.totalorder %v1478_v23, %v1349_v6  ;;  %vm854_vm2 = vmpackc.low %vm211_vm13, %vm210_vm12  ;;  %vm208_vm12 = vcmp.eq.s32.totalorder %v1504_v32, %v1346_v5  ;;  %vm209_vm13 = vcmp.eq.s32.totalorder %v1507_v33, %v1346_v5 }
  0x3d   :  { %947 = vmatpush.bf16.xpose.msk.msra.mxu3 %vm946_vm15, %v1279_v11  ;;  %vm284_vm15 = vcmp.eq.s32.totalorder %v1481_v24, %v1349_v6 }
  0x3e   :  { %vm886_vm5 = vmpackc.low %vm284_vm15, %vm283_vm14  ;;  %vm281_vm14 = vcmp.eq.s32.totalorder %v1504_v32, %v1349_v6  ;;  %vm282_vm15 = vcmp.eq.s32.totalorder %v1507_v33, %v1349_v6 }
  0x42   :  { %853 = vmatpush.bf16.xpose.msk.msra.mxu0 %vm852_vm6, %v1279_v11  ;;  %vm150_vm6 = vweird.f32 %v144_v19 }
  0x43   :  { %885 = vmatpush.bf16.xpose.msk.msra.mxu1 %vm884_vm9, %v1279_v11  ;;  %vm950_vm9 = vmpackc.low %vm439_vm4, %vm438_vm3  ;;  %vm436_vm3 = vcmp.eq.s32.totalorder %v1504_v32, %v1355_v8  ;;  %vm437_vm4 = vcmp.eq.s32.totalorder %v1507_v33, %v1355_v8 }
  0x44   :  { %917 = vmatpush.bf16.xpose.msk.msra.mxu2 %vm916_vm10, %v1279_v11  ;;  %vm152_vm10 = vmor %vm150_vm6, %vm151_vm7  ;;  %vm206_vm7 = vcmp.eq.s32.totalorder %v1335_v1, %v1346_v5 }
  0x45   :  { %949 = vmatpush.bf16.xpose.msk.msra.mxu3 %vm948_vm11, %v1279_v11  ;;  %vm155_vm11 = vcmp.eq.f32.partialorder %v154_v28, 8.507059e+37  ;;  %v153_v36 = vsel %vm152_vm10, %v1094_v22, %v149_v31  ;;  %vm920_vm6 = vmpackc.low %vm362_vm1, %vm361_vm0  ;;  %vm279_vm10 = vcmp.eq.s32.totalorder %v1335_v1, %v1349_v6  ;;  %vm435_vm0 = vcmp.eq.s32.totalorder %v1522_v37, %v1355_v8 }
  0x46   :  { %v158_v38 = vsel %vm155_vm11, %v157_v34, %v153_v36  ;;  %vm280_vm11 = vcmp.eq.s32.totalorder %v1522_v37, %v1349_v6 }
  0x47   :  { %v159_v39 = vmul.f32 %v158_v38, %v136_v35  ;;  %vm1574_vm1 = vmpackc.low %vm280_vm11, %vm279_vm10  ;;  %vm748_vm11 = vcmp.eq.s32.totalorder %v1338_v2, %v1568_v47 }
  0x49   :  { %v160_v40 = vmul.f32 %v159_v39, %v159_v39 }
  0x4a   :  { %855 = vmatpush.bf16.xpose.msk.msra.mxu0 %vm854_vm2, %v1279_v11  ;;  %vm856_vm2 = vmpackc.low %vm209_vm13, %vm208_vm12  ;;  %vm359_vm12 = vcmp.eq.s32.totalorder %v1335_v1, %v1352_v7  ;;  %vm360_vm13 = vcmp.eq.s32.totalorder %v1522_v37, %v1352_v7 }
  0x4b   :  { %887 = vmatpush.bf16.xpose.msk.msra.mxu1 %vm886_vm5, %v1279_v11  ;;  %vm888_vm5 = vmpackc.low %vm282_vm15, %vm281_vm14  ;;  %v161_v44 = vmul.f32 %v160_v40, %v160_v40  ;;  %vm434_vm15 = vcmp.eq.s32.totalorder %v1335_v1, %v1355_v8 }
  0x4c   :  { %919 = vmatpush.bf16.xpose.msk.msra.mxu2 %vm918_vm8, %v1279_v11  ;;  %vm207_vm8 = vcmp.eq.s32.totalorder %v1522_v37, %v1346_v5 }
  0x4d   :  { %951 = vmatpush.bf16.xpose.msk.msra.mxu3 %vm950_vm9, %v1279_v11  ;;  %vm952_vm9 = vmpackc.low %vm437_vm4, %vm436_vm3  ;;  %vm524_vm3 = vcmp.eq.s32.totalorder %v1341_v3, %v1537_v41  ;;  %v162_v50 = vmul.f32 %v161_v44, %v160_v40 }
  0x4e   :  { %vm1559_vm14 = vmpackc.low %vm207_vm8, %vm206_vm7  ;;  %vm673_vm8 = vcmp.eq.s32.totalorder %v1338_v2, %v1553_v45 }
  0x4f   :  { %vm1582_vm4 = vmpackc.low %vm360_vm13, %vm359_vm12  ;;  %v163_v53 = vsub.f32 0.0, %v162_v50  ;;  %vm749_vm12 = vcmp.eq.s32.totalorder %v1341_v3, %v1568_v47 }
  0x50   :  { %vm1590_vm7 = vmpackc.low %vm435_vm0, %vm434_vm15 }
  0x51   :  { %v164_v54 = vmul.f32 %v163_v53, %v163_v53  ;;  %vm1068_vm0 = vmpackc.low %vm749_vm12, %vm748_vm11  ;;  %vm519_vm12 = vcmp.eq.s32.totalorder %v1400_v12, %v1537_v41 }
  0x52   :  { %857 = vmatpush.bf16.xpose.msk.msra.mxu0 %vm856_vm2, %v1279_v11  ;;  %vm523_vm2 = vcmp.eq.s32.totalorder %v1338_v2, %v1537_v41 }
  0x53   :  { %889 = vmatpush.bf16.xpose.msk.msra.mxu1 %vm888_vm5, %v1279_v11  ;;  %vm598_vm5 = vcmp.eq.s32.totalorder %v1338_v2, %v1545_v42  ;;  %vm972_vm10 = vmpackc.low %vm524_vm3, %vm523_vm2  ;;  %v165_v56 = vadd.f32 %v164_v54, %v163_v53  ;;  %vm596_vm2 = vcmp.eq.s32.totalorder %v1358_v9, %v1545_v42  ;;  %vm597_vm3 = vcmp.eq.s32.totalorder %v1361_v10, %v1545_v42 }
  0x54   :  { %921 = vmatpush.bf16.xpose.msk.msra.mxu2 %vm920_vm6, %v1279_v11  ;;  %vm599_vm6 = vcmp.eq.s32.totalorder %v1341_v3, %v1545_v42 }
  0x55   :  { %953 = vmatpush.bf16.xpose.msk.msra.mxu3 %vm952_vm9, %v1279_v11  ;;  %vm674_vm9 = vcmp.eq.s32.totalorder %v1341_v3, %v1553_v45  ;;  %vm1004_vm13 = vmpackc.low %vm599_vm6, %vm598_vm5  ;;  %v167_v58 = vmul.f32 %v166_v55, %v165_v56  ;;  %vm672_vm5 = vcmp.eq.s32.totalorder %v1361_v10, %v1553_v45  ;;  %v1280_v3 = vmov 0.0  }
  0x56   :  { %vm1036_vm15 = vmpackc.low %vm674_vm9, %vm673_vm8  ;;  %vm747_vm8 = vcmp.eq.s32.totalorder %v1361_v10, %v1568_v47  ;;  %134 = vst [vmem:[#allocation13] sm:$0xff] %v1280_v3 }
  0x57   :  { %v168_v59 = vmul.f32 %v167_v58, %v142_v57  ;;  %vm1006_vm9 = vmpackc.low %vm597_vm3, %vm596_vm2  ;;  %vm744_vm3 = vcmp.eq.s32.totalorder %v1400_v12, %v1568_v47 }
  0x59   :  { %v169_v60 = vpack.c.bf16 %v168_v59, %v168_v59 }
  0x5a   :  { %859 = vmatpush.bf16.xpose.msk.msra.mxu0 %vm1559_vm14, %v1279_v11  ;;  %vm521_vm14 = vcmp.eq.s32.totalorder %v1358_v9, %v1537_v41 }
  0x5b   :  { %891 = vmatpush.bf16.xpose.msk.msra.mxu1 %vm1574_vm1, %v1279_v11  ;;  %vm522_vm1 = vcmp.eq.s32.totalorder %v1361_v10, %v1537_v41  ;;  %v336_v61 = vunpack.c.l.b16 %v169_v60 }
  0x5c   :  { %923 = vmatpush.bf16.xpose.msk.msra.mxu2 %vm1582_vm4, %v1279_v11  ;;  %vm671_vm4 = vcmp.eq.s32.totalorder %v1358_v9, %v1553_v45  ;;  %vm974_vm6 = vmpackc.low %vm522_vm1, %vm521_vm14  ;;  %vm669_vm14 = vcmp.eq.s32.totalorder %v1400_v12, %v1553_v45  ;;  %vm670_vm1 = vcmp.eq.s32.totalorder %v1403_v13, %v1553_v45 }
  0x5d   :  { %955 = vmatpush.bf16.xpose.msk.msra.mxu3 %vm1590_vm7, %v1279_v11  ;;  %vm746_vm7 = vcmp.eq.s32.totalorder %v1358_v9, %v1568_v47  ;;  %v1641_v62 = vpack.c.b16 %v336_v61, %v336_v61  ;;  %v275_v7 = vld [vmem:[#allocation13] sm:$0x1]  ;;  %v355_v10 = vld [vmem:[#allocation13 + $0x1] sm:$0x1]  ;;  %v505_v16 = vld [vmem:[#allocation13 + $0x3] sm:$0x1] }
  0x5e   :  { %vm1070_vm11 = vmpackc.low %vm747_vm8, %vm746_vm7  ;;  %vm517_vm8 = vcmp.eq.s32.totalorder %v1426_v14, %v1537_v41  ;;  %v730_v29 = vld [vmem:[#allocation13 + $0x6] sm:$0x1]  ;;  %v805_v30 = vld [vmem:[#allocation13 + $0x7] sm:$0x1] }
  0x5f   :  { %v415_v63 = vrot.slane %v1641_v62, 1  ;;  %v1654_v0 = vshrl.u32 %v1641_v62, 16  ;;  %v565_v4 = vrot.slane %v1641_v62, 2 }
  0x61   :  { %270 = vmatmul.bf16.vlgmr.msra.gmra.mxu0 %v169_v60  ;;  %v490_v2 = vrot.slane %v1654_v0, 1  ;;  %v640_v5 = vrot.slane %v1654_v0, 2  ;;  %v790_v6 = vrot.slane %v1654_v0, 3 }
  0x62   :  { %973 = vmatpush.bf16.xpose.msk.msrb.mxu0 %vm972_vm10, %v1279_v11  ;;  %vm1038_vm10 = vmpackc.low %vm672_vm5, %vm671_vm4  ;;  %vm745_vm4 = vcmp.eq.s32.totalorder %v1403_v13, %v1568_v47  ;;  %350 = vmatmul.bf16.vlgmr.msra.gmra.mxu1 %v1654_v0 }
  0x63   :  { %1005 = vmatpush.bf16.xpose.msk.msrb.mxu1 %vm1004_vm13, %v1279_v11  ;;  %vm520_vm13 = vcmp.eq.s32.totalorder %v1403_v13, %v1537_v41  ;;  %425 = vmatmul.bf16.vlgmr.msra.gmra.mxu2 %v415_v63  ;;  %vm1072_vm7 = vmpackc.low %vm745_vm4, %vm744_vm3  ;;  %vm515_vm4 = vcmp.eq.s32.totalorder %v1452_v20, %v1537_v41 }
  0x64   :  { %1037 = vmatpush.bf16.xpose.msk.msrb.mxu2 %vm1036_vm15, %v1279_v11  ;;  %vm594_vm15 = vcmp.eq.s32.totalorder %v1400_v12, %v1545_v42  ;;  %vm976_vm2 = vmpackc.low %vm520_vm13, %vm519_vm12  ;;  %500 = vmatmul.bf16.vlgmr.msra.gmra.mxu3 %v490_v2  ;;  %vm667_vm12 = vcmp.eq.s32.totalorder %v1426_v14, %v1553_v45  ;;  %vm668_vm13 = vcmp.eq.s32.totalorder %v1429_v15, %v1553_v45 }
  0x65   :  { %1069 = vmatpush.bf16.xpose.msk.msrb.mxu3 %vm1068_vm0, %v1279_v11  ;;  %vm595_vm0 = vcmp.eq.s32.totalorder %v1403_v13, %v1545_v42 }
  0x66   :  { %vm1008_vm5 = vmpackc.low %vm595_vm0, %vm594_vm15  ;;  %vm742_vm0 = vcmp.eq.s32.totalorder %v1426_v14, %v1568_v47 }
  0x6a   :  { %975 = vmatpush.bf16.xpose.msk.msrb.mxu0 %vm974_vm6, %v1279_v11  ;;  %vm1040_vm6 = vmpackc.low %vm670_vm1, %vm669_vm14  ;;  %vm743_vm14 = vcmp.eq.s32.totalorder %v1429_v15, %v1568_v47 }
  0x6b   :  { %1007 = vmatpush.bf16.xpose.msk.msrb.mxu1 %vm1006_vm9, %v1279_v11  ;;  %vm518_vm9 = vcmp.eq.s32.totalorder %v1429_v15, %v1537_v41  ;;  %vm1074_vm3 = vmpackc.low %vm743_vm14, %vm742_vm0  ;;  %vm513_vm14 = vcmp.eq.s32.totalorder %v1478_v23, %v1537_v41 }
  0x6c   :  { %1039 = vmatpush.bf16.xpose.msk.msrb.mxu2 %vm1038_vm10, %v1279_v11  ;;  %vm592_vm10 = vcmp.eq.s32.totalorder %v1426_v14, %v1545_v42  ;;  %vm978_vm15 = vmpackc.low %vm518_vm9, %vm517_vm8  ;;  %vm665_vm8 = vcmp.eq.s32.totalorder %v1452_v20, %v1553_v45  ;;  %vm666_vm9 = vcmp.eq.s32.totalorder %v1455_v21, %v1553_v45 }
  0x6d   :  { %1071 = vmatpush.bf16.xpose.msk.msrb.mxu3 %vm1070_vm11, %v1279_v11  ;;  %vm593_vm11 = vcmp.eq.s32.totalorder %v1429_v15, %v1545_v42 }
  0x6e   :  { %vm1010_vm1 = vmpackc.low %vm593_vm11, %vm592_vm10  ;;  %vm740_vm11 = vcmp.eq.s32.totalorder %v1452_v20, %v1568_v47 }
  0x72   :  { %977 = vmatpush.bf16.xpose.msk.msrb.mxu0 %vm976_vm2, %v1279_v11  ;;  %vm1042_vm2 = vmpackc.low %vm668_vm13, %vm667_vm12  ;;  %vm741_vm12 = vcmp.eq.s32.totalorder %v1455_v21, %v1568_v47 }
  0x73   :  { %1009 = vmatpush.bf16.xpose.msk.msrb.mxu1 %vm1008_vm5, %v1279_v11  ;;  %vm516_vm5 = vcmp.eq.s32.totalorder %v1455_v21, %v1537_v41  ;;  %vm1076_vm0 = vmpackc.low %vm741_vm12, %vm740_vm11  ;;  %vm511_vm12 = vcmp.eq.s32.totalorder %v1504_v32, %v1537_v41 }
  0x74   :  { %1041 = vmatpush.bf16.xpose.msk.msrb.mxu2 %vm1040_vm6, %v1279_v11  ;;  %vm590_vm6 = vcmp.eq.s32.totalorder %v1452_v20, %v1545_v42  ;;  %vm980_vm10 = vmpackc.low %vm516_vm5, %vm515_vm4  ;;  %vm663_vm4 = vcmp.eq.s32.totalorder %v1478_v23, %v1553_v45  ;;  %vm664_vm5 = vcmp.eq.s32.totalorder %v1481_v24, %v1553_v45 }
  0x75   :  { %1073 = vmatpush.bf16.xpose.msk.msrb.mxu3 %vm1072_vm7, %v1279_v11  ;;  %vm591_vm7 = vcmp.eq.s32.totalorder %v1455_v21, %v1545_v42 }
  0x76   :  { %vm1012_vm13 = vmpackc.low %vm591_vm7, %vm590_vm6  ;;  %vm738_vm7 = vcmp.eq.s32.totalorder %v1478_v23, %v1568_v47 }
  0x7a   :  { %979 = vmatpush.bf16.xpose.msk.msrb.mxu0 %vm978_vm15, %v1279_v11  ;;  %vm1044_vm15 = vmpackc.low %vm666_vm9, %vm665_vm8  ;;  %vm739_vm8 = vcmp.eq.s32.totalorder %v1481_v24, %v1568_v47 }
  0x7b   :  { %1011 = vmatpush.bf16.xpose.msk.msrb.mxu1 %vm1010_vm1, %v1279_v11  ;;  %vm514_vm1 = vcmp.eq.s32.totalorder %v1481_v24, %v1537_v41  ;;  %vm1078_vm11 = vmpackc.low %vm739_vm8, %vm738_vm7  ;;  %vm509_vm8 = vcmp.eq.s32.totalorder %v1335_v1, %v1537_v41 }
  0x7c   :  { %1043 = vmatpush.bf16.xpose.msk.msrb.mxu2 %vm1042_vm2, %v1279_v11  ;;  %vm588_vm2 = vcmp.eq.s32.totalorder %v1478_v23, %v1545_v42  ;;  %vm982_vm6 = vmpackc.low %vm514_vm1, %vm513_vm14  ;;  %vm661_vm14 = vcmp.eq.s32.totalorder %v1504_v32, %v1553_v45  ;;  %vm662_vm1 = vcmp.eq.s32.totalorder %v1507_v33, %v1553_v45  ;;  %v580_v23 = vld [vmem:[#allocation13 + $0x4] sm:$0x1] }
  0x7d   :  { %1075 = vmatpush.bf16.xpose.msk.msrb.mxu3 %vm1074_vm3, %v1279_v11  ;;  %vm589_vm3 = vcmp.eq.s32.totalorder %v1481_v24, %v1545_v42  ;;  %v655_v24 = vld [vmem:[#allocation13 + $0x5] sm:$0x1] }
  0x7e   :  { %vm1014_vm9 = vmpackc.low %vm589_vm3, %vm588_vm2  ;;  %vm736_vm3 = vcmp.eq.s32.totalorder %v1504_v32, %v1568_v47 }
  0x82   :  { %981 = vmatpush.bf16.xpose.msk.msrb.mxu0 %vm980_vm10, %v1279_v11  ;;  %vm1046_vm10 = vmpackc.low %vm664_vm5, %vm663_vm4  ;;  %vm737_vm4 = vcmp.eq.s32.totalorder %v1507_v33, %v1568_v47 }
  0x83   :  { %1013 = vmatpush.bf16.xpose.msk.msrb.mxu1 %vm1012_vm13, %v1279_v11  ;;  %vm512_vm13 = vcmp.eq.s32.totalorder %v1507_v33, %v1537_v41  ;;  %vm1080_vm7 = vmpackc.low %vm737_vm4, %vm736_vm3 }
  0x84   :  { %1045 = vmatpush.bf16.xpose.msk.msrb.mxu2 %vm1044_vm15, %v1279_v11  ;;  %vm586_vm15 = vcmp.eq.s32.totalorder %v1504_v32, %v1545_v42  ;;  %vm984_vm2 = vmpackc.low %vm512_vm13, %vm511_vm12  ;;  %vm659_vm12 = vcmp.eq.s32.totalorder %v1335_v1, %v1553_v45  ;;  %vm660_vm13 = vcmp.eq.s32.totalorder %v1522_v37, %v1553_v45 }
  0x85   :  { %1077 = vmatpush.bf16.xpose.msk.msrb.mxu3 %vm1076_vm0, %v1279_v11  ;;  %vm587_vm0 = vcmp.eq.s32.totalorder %v1507_v33, %v1545_v42 }
  0x86   :  { %vm1016_vm5 = vmpackc.low %vm587_vm0, %vm586_vm15  ;;  %vm734_vm0 = vcmp.eq.s32.totalorder %v1335_v1, %v1568_v47 }
  0x8a   :  { %983 = vmatpush.bf16.xpose.msk.msrb.mxu0 %vm982_vm6, %v1279_v11  ;;  %vm1048_vm6 = vmpackc.low %vm662_vm1, %vm661_vm14  ;;  %vm735_vm14 = vcmp.eq.s32.totalorder %v1522_v37, %v1568_v47 }
  0x8b   :  { %1015 = vmatpush.bf16.xpose.msk.msrb.mxu1 %vm1014_vm9, %v1279_v11  ;;  %vm510_vm9 = vcmp.eq.s32.totalorder %v1522_v37, %v1537_v41  ;;  %vm1082_vm3 = vmpackc.low %vm735_vm14, %vm734_vm0 }
  0x8c   :  { %1047 = vmatpush.bf16.xpose.msk.msrb.mxu2 %vm1046_vm10, %v1279_v11  ;;  %vm584_vm10 = vcmp.eq.s32.totalorder %v1335_v1, %v1545_v42  ;;  %vm986_vm15 = vmpackc.low %vm510_vm9, %vm509_vm8  ;;  %v715_v1 = vrot.slane %v1641_v62, 3 }
  0x8d   :  { %1079 = vmatpush.bf16.xpose.msk.msrb.mxu3 %vm1078_vm11, %v1279_v11  ;;  %vm585_vm11 = vcmp.eq.s32.totalorder %v1522_v37, %v1545_v42 }
  0x8e   :  { %vm1018_vm1 = vmpackc.low %vm585_vm11, %vm584_vm10 }
  0x92   :  { %985 = vmatpush.bf16.xpose.msk.msrb.mxu0 %vm984_vm2, %v1279_v11  ;;  %vm1050_vm2 = vmpackc.low %vm660_vm13, %vm659_vm12 }
  0x93   :  { %1017 = vmatpush.bf16.xpose.msk.msrb.mxu1 %vm1016_vm5, %v1279_v11 }
  0x94   :  { %1049 = vmatpush.bf16.xpose.msk.msrb.mxu2 %vm1048_vm6, %v1279_v11 }
  0x95   :  { %1081 = vmatpush.bf16.xpose.msk.msrb.mxu3 %vm1080_vm7, %v1279_v11 }
  0x9a   :  { %987 = vmatpush.bf16.xpose.msk.msrb.mxu0 %vm986_vm15, %v1279_v11 }
  0x9b   :  { %1019 = vmatpush.bf16.xpose.msk.msrb.mxu1 %vm1018_vm1, %v1279_v11 }
  0x9c   :  { %1051 = vmatpush.bf16.xpose.msk.msrb.mxu2 %vm1050_vm2, %v1279_v11 }
  0x9d   :  { %1083 = vmatpush.bf16.xpose.msk.msrb.mxu3 %vm1082_vm3, %v1279_v11  ;;  %v430_v11 = vld [vmem:[#allocation13 + $0x2] sm:$0x1] }
  0xa1   :  { %575 = vmatmul.bf16.vlgmr.msrb.gmra.mxu0 %v565_v4 }
  0xa2   :  { %650 = vmatmul.bf16.vlgmr.msrb.gmra.mxu1 %v640_v5 }
  0xa3   :  { %725 = vmatmul.bf16.vlgmr.msrb.gmra.mxu2 %v715_v1 }
  0xa4   :  { %800 = vmatmul.bf16.vlgmr.msrb.gmra.mxu3 %v790_v6 }
  0xde   :  { %v271_v8 = vpop.f32.mrf.mxu0 }
  0xdf   :  { %v276_v9 = vadd.f32 %v275_v7, %v271_v8  ;;  %v351_v12 = vpop.f32.mrf.mxu1 }
  0xe0   :  { %v356_v13 = vadd.f32 %v355_v10, %v351_v12 }
  0xe1   :  { %277 = vst [vmem:[#allocation13] sm:$0x1] %v276_v9 }
  0xe2   :  { %357 = vst [vmem:[#allocation13 + $0x1] sm:$0x1] %v356_v13 }
  0xe6   :  { %v273_v14 = vpop.f32.mrf.mxu0  ;;  %v426_v15 = vpop.f32.mrf.mxu2 }
  0xe7   :  { %v431_v17 = vadd.f32 %v430_v11, %v426_v15  ;;  %v501_v18 = vpop.f32.mrf.mxu3  ;;  %v353_v19 = vpop.f32.mrf.mxu1 }
  0xe8   :  { %v506_v20 = vadd.f32 %v505_v16, %v501_v18 }
  0xe9   :  { %432 = vst [vmem:[#allocation13 + $0x2] sm:$0x1] %v431_v17 }
  0xea   :  { %507 = vst [vmem:[#allocation13 + $0x3] sm:$0x1] %v506_v20 }
  0xee   :  { %v428_v21 = vpop.f32.mrf.mxu2 }
  0xef   :  { %v503_v22 = vpop.f32.mrf.mxu3 }
 0x11e   :  { %v576_v25 = vpop.f32.mrf.mxu0 }
 0x11f   :  { %v581_v26 = vadd.f32 %v580_v23, %v576_v25  ;;  %v651_v27 = vpop.f32.mrf.mxu1 }
 0x120   :  { %v656_v28 = vadd.f32 %v655_v24, %v651_v27 }
 0x121   :  { %582 = vst [vmem:[#allocation13 + $0x4] sm:$0x1] %v581_v26 }
 0x122   :  { %657 = vst [vmem:[#allocation13 + $0x5] sm:$0x1] %v656_v28 }
 0x126   :  { %v726_v31 = vpop.f32.mrf.mxu2  ;;  %v578_v32 = vpop.f32.mrf.mxu0 }
 0x127   :  { %v731_v33 = vadd.f32 %v730_v29, %v726_v31  ;;  %v801_v34 = vpop.f32.mrf.mxu3  ;;  %v653_v35 = vpop.f32.mrf.mxu1 }
 0x128   :  { %v806_v36 = vadd.f32 %v805_v30, %v801_v34 }
 0x129   :  { %732 = vst [vmem:[#allocation13 + $0x6] sm:$0x1] %v731_v33 }
 0x12a   :  { %807 = vst [vmem:[#allocation13 + $0x7] sm:$0x1] %v806_v36 }
 0x12b   :  { %818 = dma.vmem_to_hbm [thread:$0]  %s814_s5, 128, %s816_s25, [#allocation4]  }
 0x12e   :  { %v728_v37 = vpop.f32.mrf.mxu2 }
 0x12f   :  { %v803_v38 = vpop.f32.mrf.mxu3 }
 0x130   :  { %1271 = dma.done.wait [#allocation4], 128  }
 0x131   :  { %1272 = vsyncadd [#allocation4], 4294967168 }
 0x132   :  { %823 = vsyncpa [#allocation3], 1 }
 0x133   :  { %824 = vsyncpa [#allocation6], 1 }
 0x134   :  { %825 = vsyncpa [#allocation9], 1 }
 0x135   :  { %826 = vsyncpa [#allocation12], 1 }
 0x136   :  { %827 = vsyncpa [#allocation4], 1 }

</bundles_post_ra>
